<compile_context>
chip_gen: v5e
topology: v5e:2x2
jax: 0.10.0
libtpu: 0.0.40
codegen_flags: <defaults>
</compile_context>

<pallas_src>
import functools

import jax
import jax.numpy as jnp
from jax.experimental import pallas as pl
from jax.experimental.pallas import tpu as pltpu


def _round_up(n: int, m: int) -> int:
    return ((n + m - 1) // m) * m


def _round_down(n: int, m: int) -> int:
    return (n // m) * m


@functools.lru_cache(maxsize=1)
def _tpu_topology():
    """(tensorcores_per_chip, physical_vmem_bytes_per_core, default_scoped_vmem_bytes).

    Conservative fallbacks if the generation cannot be identified.
    """
    n_tc, vmem_phys, vmem_default = 1, 128 << 20, 16 << 20   # v5e-like floor
    try:
        kind = jax.devices()[0].device_kind.lower()
    except Exception:
        kind = ""
    if "v7" in kind:
        n_tc, vmem_phys, vmem_default = 2, 64 << 20, 32 << 20
    elif "v6" in kind:
        n_tc, vmem_phys, vmem_default = 1, 128 << 20, 32 << 20
    elif "v5" in kind:
        n_tc, vmem_phys, vmem_default = 1, 128 << 20, 16 << 20
    # Refine physical VMEM from the runtime when the query is available; take
    # the min so a per-chip number on a 2-TC part can never over-budget a core.
    try:
        cap = getattr(pltpu.get_tpu_info(), "vmem_capacity_bytes", None)
        if cap:
            vmem_phys = min(vmem_phys, int(cap))
    except Exception:
        pass
    return n_tc, vmem_phys, vmem_default


def highway_kernel(x_ref, w_ref, b_ref, o_ref):
    x = x_ref[...]                                    # (TB, D) in x dtype
    d = x.shape[-1]

    # Single fused MXU matmul over the packed [W_lin^T | W_gate^T] weights;
    # f32 accumulation.  x is cast to the (possibly bf16) weight dtype only
    # for the matmul operands.
    acc = jnp.dot(x.astype(w_ref.dtype), w_ref[...],
                  preferred_element_type=jnp.float32)
    acc = acc + b_ref[...]                            # (TB, 2*Dp) f32

    dh = acc.shape[-1] // 2                           # lane-aligned half width (Dp)
    lin = acc[:, :d]                                  # leading slice of lin half
    gate_lin = acc[:, dh:dh + d]                      # gate half starts lane-aligned

    out = jnp.maximum(lin, 0.0)                       # ReLU (VPU)
    gate = jax.nn.sigmoid(gate_lin)                   # sigmoid (EUP)

    xf = x.astype(jnp.float32)                        # f32 epilogue (v5e: no bf16 VPU)
    y = xf + gate * (out - xf)                        # == out*gate + (1-gate)*x
    o_ref[...] = y.astype(o_ref.dtype)


def pack_highway_params(w_lin, b_lin, w_gate, b_gate, *, matmul_dtype=jnp.bfloat16):
    """One-time (init-time) weight packing.

    PyTorch-layout (D_out, D_in) weights are transposed, lane-padded to a
    multiple of 128 output columns per half, and concatenated into a single
    (D, 2*Dp) matrix; biases into (1, 2*Dp).  Done ONCE at model init so the
    per-forward wrapper performs no HBM-level preprocessing and the in-kernel
    lin/gate split stays lane-tile aligned.
    """
    w_lin = jnp.asarray(w_lin)
    w_gate = jnp.asarray(w_gate)
    d_out, d_in = w_lin.shape
    assert d_out == d_in == w_gate.shape[0] == w_gate.shape[1], "highway is square"
    d = d_in
    d_pad = _round_up(d, 128)
    pad_cols = d_pad - d

    wl, wg = w_lin.T, w_gate.T                                   # (D, D)
    bl = jnp.asarray(b_lin).reshape(1, d).astype(jnp.float32)
    bg = jnp.asarray(b_gate).reshape(1, d).astype(jnp.float32)
    if pad_cols:
        wl = jnp.pad(wl, ((0, 0), (0, pad_cols)))
        wg = jnp.pad(wg, ((0, 0), (0, pad_cols)))
        bl = jnp.pad(bl, ((0, 0), (0, pad_cols)))
        bg = jnp.pad(bg, ((0, 0), (0, pad_cols)))

    w_cat = jnp.concatenate([wl, wg], axis=1).astype(matmul_dtype)   # (D, 2*Dp)
    b_cat = jnp.concatenate([bl, bg], axis=1).astype(jnp.float32)    # (1, 2*Dp)
    return w_cat, b_cat


def _choose_tile_b(B, cap, min_steps):
    """Pick a batch tile.  Returns (tile_b, needs_pad)."""
    cap = max(8, min(cap, B))
    if B <= cap and min_steps <= 1:
        return B, False                        # one full block: no pad, no 8-align need
    steps = max(min_steps, pl.cdiv(B, cap))
    target = pl.cdiv(B, steps)
    # Prefer the largest multiple-of-8 divisor of B at or below the target tile
    # so no padding / output slicing is needed.
    start = _round_down(min(target, cap), 8)
    for t in range(start, 7, -8):
        if B % t == 0:
            return t, False
    # No clean divisor: fall back to padded tail (rare: B with no mult-of-8 divisor).
    tile = min(_round_up(target, 8), max(8, _round_down(cap, 8)))
    return tile, (B % tile) != 0


def highway_layer(x, w_cat, b_cat, *, tile_b=None):
    """x: (B, D).  w_cat: (D, 2*Dp) packed weights.  b_cat: (1, 2*Dp) packed biases."""
    B, D = x.shape
    two_dpad = w_cat.shape[1]
    assert w_cat.shape[0] == D and two_dpad % 2 == 0, w_cat.shape
    d_pad = two_dpad // 2
    assert d_pad >= D and b_cat.shape == (1, two_dpad), (b_cat.shape, d_pad, D)

    n_tc, vmem_phys, vmem_default = _tpu_topology()

    x_itemsize = jnp.dtype(x.dtype).itemsize
    w_itemsize = jnp.dtype(w_cat.dtype).itemsize
    w_bytes = w_cat.size * w_itemsize + b_cat.size * 4            # single VMEM copy

    # TODO(synk): once w_bytes approaches the per-core VMEM (D >~ 2800 bf16 on
    # v7x), switch to an output-feature grid axis with (D, TN) weight blocks.
    assert w_bytes <= vmem_phys - (16 << 20), (
        "packed weights too large for whole-array VMEM residency; needs the "
        "TODO(synk) output-feature grid axis")

    # Per-row VMEM footprint: pipelined x/out tiles (double-buffered), the f32
    # accumulator, the matmul-dtype cast copy of x and the f32 epilogue temps.
    per_row = (2 * 2 * D * x_itemsize          # x + out tiles, double-buffered
               + 2 * d_pad * 4                 # f32 (TB, 2*Dp) accumulator
               + D * w_itemsize                # matmul-dtype cast of x
               + 3 * d_pad * 4)                # relu / gate / blend temps

    # --- batch tile selection -------------------------------------------------
    if tile_b is None:
        headroom = 8 << 20                     # compiler scratch / spills
        tile_budget = max(vmem_phys - headroom - w_bytes, 1 << 20)
        cap = int(min(1024, max(8, tile_budget // per_row)))
        min_steps = 1
        if n_tc > 1:                           # v7x: shard across TCs, keep tiles >=256
            if B >= 2 * n_tc * 256:
                min_steps = 2 * n_tc           # >=2 steps per core -> per-core pipelining
            elif B >= n_tc * 256:
                min_steps = n_tc
        tile_b, needs_pad = _choose_tile_b(B, cap, min_steps)
    else:
        tile_b = int(min(tile_b, B))
        if tile_b < B and tile_b % 8:
            tile_b = min(B, _round_up(tile_b, 8))   # f32 sublane alignment
        needs_pad = (B % tile_b) != 0

    num_tiles = pl.cdiv(B, tile_b)
    b_padded = num_tiles * tile_b
    x_in = x if not needs_pad else jnp.pad(x, ((0, b_padded - B), (0, 0)))

    # --- VMEM limit: explicit, generation-aware --------------------------------
    vmem_needed = w_bytes + tile_b * per_row
    vmem_limit = int(min(max(int(vmem_needed * 1.25) + (2 << 20), vmem_default),
                         vmem_phys - (4 << 20)))

    # --- scheduler hint ---------------------------------------------------------
    cost = pl.CostEstimate(
        flops=2 * B * D * two_dpad + 6 * B * D,
        transcendentals=B * D,                 # sigmoid
        bytes_accessed=2 * B * D * x_itemsize + w_cat.size * w_itemsize + b_cat.size * 4,
    )

    grid_spec = pltpu.PrefetchScalarGridSpec(
        num_scalar_prefetch=0,
        grid=(num_tiles,),
        in_specs=[
            # x tile: pipelined (double-buffered) over the batch grid axis.
            pl.BlockSpec((tile_b, D), lambda i: (i, 0)),
            # Packed weights / biases: whole-array VMEM residents, single copy.
            pl.BlockSpec(memory_space=pltpu.MemorySpace.VMEM),
            pl.BlockSpec(memory_space=pltpu.MemorySpace.VMEM),
        ],
        out_specs=pl.BlockSpec((tile_b, D), lambda i: (i, 0)),
    )

    out = pl.pallas_call(
        highway_kernel,
        out_shape=jax.ShapeDtypeStruct((b_padded, D), x.dtype),
        grid_spec=grid_spec,
        compiler_params=pltpu.CompilerParams(
            dimension_semantics=("parallel",),
            vmem_limit_bytes=vmem_limit,
        ),
        cost_estimate=cost,
    )(x_in, w_cat, b_cat)

    return out if b_padded == B else out[:B]


def highway_ref(x, w_lin, b_lin, w_gate, b_gate):
    """Pure-JAX reference matching the PyTorch forward."""
    out = jax.nn.relu(x @ w_lin.T + b_lin)
    gate = jax.nn.sigmoid(x @ w_gate.T + b_gate)
    return out * gate + (1.0 - gate) * x


if __name__ == "__main__":
    size = 128   # hidden size (lane-aligned)
    batch = 8    # sublane-aligned

    key = jax.random.PRNGKey(0)
    kx, kw1, kb1, kw2, kx2, kx3 = jax.random.split(key, 6)

    x = jax.random.normal(kx, (batch, size), dtype=jnp.float32)

    # nn.Linear default init ~ U(-1/sqrt(size), 1/sqrt(size)); deterministic here.
    bound = 1.0 / (size ** 0.5)
    w_lin = jax.random.uniform(kw1, (size, size), jnp.float32, -bound, bound)
    b_lin = jax.random.uniform(kb1, (size,), jnp.float32, -bound, bound)
    w_gate = jax.random.uniform(kw2, (size, size), jnp.float32, -bound, bound)
    b_gate = jnp.zeros((size,), dtype=jnp.float32)

    y_ref = highway_ref(x, w_lin, b_lin, w_gate, b_gate)

    # f32 matmul path: tight check of the fused-kernel structure.
    w32, b32 = pack_highway_params(w_lin, b_lin, w_gate, b_gate,
                                   matmul_dtype=jnp.float32)
    y32 = jax.block_until_ready(highway_layer(x, w32, b32))
    assert y32.shape == (batch, size)
    assert jnp.allclose(y32, y_ref, atol=1e-5, rtol=1e-5), "f32 path mismatch"

    # bf16 weights path (default packing; halves weight HBM/VMEM traffic).
    wbf, bbf = pack_highway_params(w_lin, b_lin, w_gate, b_gate)
    ybf = jax.block_until_ready(highway_layer(x, wbf, bbf))
    assert jnp.allclose(ybf, y_ref, atol=3e-2, rtol=3e-2), "bf16 weight path mismatch"

    # bf16 activations path: bf16 in / bf16 out, f32 accumulation + epilogue.
    xbf = x.astype(jnp.bfloat16)
    ybf16 = jax.block_until_ready(highway_layer(xbf, wbf, bbf))
    assert ybf16.dtype == jnp.bfloat16
    assert jnp.allclose(ybf16.astype(jnp.float32), y_ref, atol=6e-2, rtol=6e-2), \
        "bf16 activation path mismatch"

    # Non-multiple-of-8 batch: handled as a single full block (no pad / slice).
    x2 = jax.random.normal(kx2, (20, size), dtype=jnp.float32)
    y2_ref = highway_ref(x2, w_lin, b_lin, w_gate, b_gate)
    y2 = jax.block_until_ready(highway_layer(x2, w32, b32))
    assert y2.shape == (20, size)
    assert jnp.allclose(y2, y2_ref, atol=1e-5, rtol=1e-5), "full-block odd-B mismatch"

    # Explicit non-dividing tile: exercises the padded-tail fallback path.
    y2b = jax.block_until_ready(highway_layer(x2, w32, b32, tile_b=16))
    assert y2b.shape == (20, size)
    assert jnp.allclose(y2b, y2_ref, atol=1e-5, rtol=1e-5), "padded-tail mismatch"

    # Larger batch: multi-step grid with divisor tiles (no pad, no output slice).
    x3 = jax.random.normal(kx3, (1024, size), dtype=jnp.float32)
    y3_ref = highway_ref(x3, w_lin, b_lin, w_gate, b_gate)
    y3 = jax.block_until_ready(highway_layer(x3, w32, b32, tile_b=256))
    assert y3.shape == (1024, size)
    assert jnp.allclose(y3, y3_ref, atol=1e-4, rtol=1e-4), "multi-tile mismatch"

    print("KERNEL_OK")
</pallas_src>

<mosaic_0001>
module attributes {stable_mosaic.version = 11 : i64} {
  func.func @highway_kernel(%arg0: i32, %arg1: memref<8x128xf32, #tpu.memory_space<vmem>>, %arg2: memref<128x256xf32, #tpu.memory_space<vmem>>, %arg3: memref<1x256xf32, #tpu.memory_space<vmem>>, %arg4: memref<8x128xf32, #tpu.memory_space<vmem>>) attributes {dimension_semantics = [#tpu.dimension_semantics<parallel>], iteration_bounds = array<i64: 1>, scalar_prefetch = 0 : i64, scratch_operands = 0 : i64, tpu.core_type = #tpu.core_type<tc>, window_params = [{transform_indices = @transform_0, window_bounds = array<i64: 8, 128>}, {pipeline_mode = #tpu.pipeline_mode<synchronous>, transform_indices = @transform_1, window_bounds = array<i64: 128, 256>}, {pipeline_mode = #tpu.pipeline_mode<synchronous>, transform_indices = @transform_2, window_bounds = array<i64: 1, 256>}, {transform_indices = @transform_3, window_bounds = array<i64: 8, 128>}]} {
    %c0 = arith.constant 0 : index
    %c0_0 = arith.constant 0 : index
    %0 = vector.load %arg1[%c0, %c0_0] : memref<8x128xf32, #tpu.memory_space<vmem>>, vector<8x128xf32>
    %c0_1 = arith.constant 0 : index
    %c0_2 = arith.constant 0 : index
    %1 = vector.load %arg2[%c0_1, %c0_2] : memref<128x256xf32, #tpu.memory_space<vmem>>, vector<128x256xf32>
    %cst = arith.constant dense<0.000000e+00> : vector<8x256xf32>
    %2 = tpu.matmul %0, %1, %cst {dimension_numbers = #tpu.dot_dimension_numbers<[1], [0], [0], [1], [0, 0, 1, 1], [], []>} : vector<8x128xf32>, vector<128x256xf32>, vector<8x256xf32> -> vector<8x256xf32>
    %c0_3 = arith.constant 0 : index
    %c0_4 = arith.constant 0 : index
    %3 = vector.load %arg3[%c0_3, %c0_4] : memref<1x256xf32, #tpu.memory_space<vmem>>, vector<1x256xf32>
    %4 = vector.broadcast %3 : vector<1x256xf32> to vector<8x256xf32>
    %5 = arith.addf %2, %4 : vector<8x256xf32>
    %6 = vector.extract_strided_slice %5 {offsets = [0, 0], sizes = [8, 128], strides = [1, 1]} : vector<8x256xf32> to vector<8x128xf32>
    %7 = vector.extract_strided_slice %5 {offsets = [0, 128], sizes = [8, 128], strides = [1, 1]} : vector<8x256xf32> to vector<8x128xf32>
    %cst_5 = arith.constant 0.000000e+00 : f32
    %8 = vector.broadcast %cst_5 : f32 to vector<8x128xf32>
    %9 = arith.maximumf %6, %8 : vector<8x128xf32>
    %10 = arith.negf %7 : vector<8x128xf32>
    %11 = math.exp %10 : vector<8x128xf32>
    %cst_6 = arith.constant 1.000000e+00 : f32
    %12 = vector.broadcast %cst_6 : f32 to vector<8x128xf32>
    %13 = arith.addf %12, %11 : vector<8x128xf32>
    %14 = arith.divf %12, %13 : vector<8x128xf32>
    %15 = arith.subf %9, %0 : vector<8x128xf32>
    %16 = arith.mulf %14, %15 : vector<8x128xf32>
    %17 = arith.addf %0, %16 : vector<8x128xf32>
    %c0_7 = arith.constant 0 : index
    %c0_8 = arith.constant 0 : index
    %18 = vector.load %arg4[%c0_7, %c0_8] : memref<8x128xf32, #tpu.memory_space<vmem>>, vector<8x128xf32>
    tpu.vector_store %arg4[%c0_7, %c0_8], %17 {strides = array<i32>} : memref<8x128xf32, #tpu.memory_space<vmem>>, vector<8x128xf32>,
    return
  }
  func.func @transform_0(%arg0: i32) -> (i32, i32) {
    %c0_i32 = arith.constant 0 : i32
    %c0_i32_0 = arith.constant 0 : i32
    return %arg0, %c0_i32 : i32, i32
  }
  func.func @transform_1(%arg0: i32) -> (i32, i32) {
    %c0_i32 = arith.constant 0 : i32
    %c0_i32_0 = arith.constant 0 : i32
    %c0_i32_1 = arith.constant 0 : i32
    return %c0_i32, %c0_i32_0 : i32, i32
  }
  func.func @transform_2(%arg0: i32) -> (i32, i32) {
    %c0_i32 = arith.constant 0 : i32
    %c0_i32_0 = arith.constant 0 : i32
    %c0_i32_1 = arith.constant 0 : i32
    return %c0_i32, %c0_i32_0 : i32, i32
  }
  func.func @transform_3(%arg0: i32) -> (i32, i32) {
    %c0_i32 = arith.constant 0 : i32
    %c0_i32_0 = arith.constant 0 : i32
    return %arg0, %c0_i32 : i32, i32
  }
}

</mosaic_0001>

<bundles_post_ra>
// kernel: tpu_custom_call.1
= control target key start
LH: loop header
LB: loop body
LE: loop exit
PB: predicated region body
PF: predicated region fallthrough
CT: control target
= control target key end

     0   :  { %8 = vsyncpa [#allocation3], 0  ;;  %s330_s0 = inlined_call_operand.hbm [shape: f32[8,128], index: 0, kind: input, shape index: {}]   ;;  %s331_s1 = inlined_call_operand.hbm [shape: f32[128,256], index: 1, kind: input, shape index: {}]   ;;  %s332_s2 = inlined_call_operand.hbm [shape: f32[1,256], index: 2, kind: input, shape index: {}]   ;;  %s333_s3 = inlined_call_operand.hbm [shape: f32[8,128], index: 3, kind: output, shape index: {}]  }
   0x1   :  { %9 = vsyncpa [#allocation6], 0  ;;  %s26_s14 = sshll.u32 %s331_s1, 4  ;;  %s27_s14 = int_to_ptr.hbm [resolvable:$true] %s26_s14 }
   0x2   :  { %10 = vsyncpa [#allocation4], 0  ;;  %s292_s15 = smov [#allocation5]   ;;  %s16_s19 = sshll.u32 %s330_s0, 4  ;;  %s17_s19 = int_to_ptr.hbm [resolvable:$true] %s16_s19 }
   0x3   :  { %s28_s16 = sshll.u32 %s292_s15, 4  ;;  %s293_s20 = smov 256   ;;  %s29_s16 = int_to_ptr.vmem [resolvable:$true] %s28_s16 }
   0x4   :  { %s294_s21 = smov 16   ;;  %s295_s22 = smov [#allocation2]  }
   0x5   :  { %34 = dma.hbm_to_vmem [thread:$0]  %s27_s14, 4096, %s29_s16, [#allocation6], %s293_s20, %s293_s20, %s294_s21  }
   0x6   :  { %s18_s23 = sshll.u32 %s295_s22, 4  ;;  %s40_s26 = sshll.u32 %s332_s2, 4  ;;  %s19_s23 = int_to_ptr.vmem [resolvable:$true] %s18_s23  ;;  %s41_s26 = int_to_ptr.hbm [resolvable:$true] %s40_s26 }
   0x7   :  { %21 = dma.hbm_to_vmem [thread:$0]  %s17_s19, 128, %s19_s23, [#allocation3]  }
   0x8   :  { %s296_s1 = smov [#allocation7]  }
   0x9   :  { %s42_s27 = sshll.u32 %s296_s1, 4  ;;  %s43_s27 = int_to_ptr.vmem [resolvable:$true] %s42_s27 }
   0xa   :  { %45 = dma.hbm_to_vmem [thread:$0]  %s41_s26, 32, %s43_s27, [#allocation6]  }
   0xb   :  { %286 = dma.done.wait [#allocation3], 128  }
   0xc   :  { %287 = vsyncadd [#allocation3], 4294967168 }
   0xd   :  { %288 = dma.done.wait [#allocation6], 4128  }
   0xe   :  { %289 = vsyncadd [#allocation6], 4294963168  ;;  %v90_v0 = vld [vmem:[#allocation5 + $0xf8] sm:$0xff]  ;;  %v88_v1 = vld [vmem:[#allocation5 + $0xe8] sm:$0xff]  ;;  %s297_s0 = smov [#allocation8]   ;;  %s168_s30 = sshll.u32 %s333_s3, 4  ;;  %s169_s30 = int_to_ptr.hbm [resolvable:$true] %s168_s30 }
   0xf   :  { %117 = vmatpush.msra.mxu1 %v90_v0  ;;  %v86_v2 = vld [vmem:[#allocation5 + $0xd8] sm:$0xff]  ;;  %v84_v3 = vld [vmem:[#allocation5 + $0xc8] sm:$0xff]  ;;  %v89_v4 = vld [vmem:[#allocation5 + $0xf0] sm:$0xff]  ;;  %s166_s2 = sshll.u32 %s297_s0, 4  ;;  %s167_s2 = int_to_ptr.vmem [resolvable:$true] %s166_s2 }
  0x10   :  { %v87_v5 = vld [vmem:[#allocation5 + $0xe0] sm:$0xff]  ;;  %97 = vmatpush.msra.mxu0 %v89_v4  ;;  %v82_v6 = vld [vmem:[#allocation5 + $0xb8] sm:$0xff]  ;;  %v85_v7 = vld [vmem:[#allocation5 + $0xd0] sm:$0xff] }
  0x11   :  { %118 = vmatpush.msra.mxu1 %v88_v1  ;;  %v80_v8 = vld [vmem:[#allocation5 + $0xa8] sm:$0xff]  ;;  %v83_v9 = vld [vmem:[#allocation5 + $0xc0] sm:$0xff]  ;;  %v78_v10 = vld [vmem:[#allocation5 + $0x98] sm:$0xff] }
  0x12   :  { %98 = vmatpush.msra.mxu0 %v87_v5  ;;  %v81_v11 = vld [vmem:[#allocation5 + $0xb0] sm:$0xff]  ;;  %v76_v12 = vld [vmem:[#allocation5 + $0x88] sm:$0xff]  ;;  %v79_v13 = vld [vmem:[#allocation5 + $0xa0] sm:$0xff] }
  0x13   :  { %119 = vmatpush.msra.mxu1 %v86_v2  ;;  %v74_v14 = vld [vmem:[#allocation5 + $0x78] sm:$0xff]  ;;  %v77_v15 = vld [vmem:[#allocation5 + $0x90] sm:$0xff]  ;;  %v72_v16 = vld [vmem:[#allocation5 + $0x68] sm:$0xff] }
  0x14   :  { %99 = vmatpush.msra.mxu0 %v85_v7  ;;  %v75_v17 = vld [vmem:[#allocation5 + $0x80] sm:$0xff]  ;;  %v70_v18 = vld [vmem:[#allocation5 + $0x58] sm:$0xff]  ;;  %v73_v19 = vld [vmem:[#allocation5 + $0x70] sm:$0xff] }
  0x15   :  { %120 = vmatpush.msra.mxu1 %v84_v3  ;;  %v68_v20 = vld [vmem:[#allocation5 + $0x48] sm:$0xff]  ;;  %v71_v21 = vld [vmem:[#allocation5 + $0x60] sm:$0xff]  ;;  %v66_v22 = vld [vmem:[#allocation5 + $0x38] sm:$0xff] }
  0x16   :  { %100 = vmatpush.msra.mxu0 %v83_v9  ;;  %v69_v23 = vld [vmem:[#allocation5 + $0x50] sm:$0xff]  ;;  %v64_v24 = vld [vmem:[#allocation5 + $0x28] sm:$0xff]  ;;  %v67_v25 = vld [vmem:[#allocation5 + $0x40] sm:$0xff] }
  0x17   :  { %121 = vmatpush.msra.mxu1 %v82_v6  ;;  %v62_v26 = vld [vmem:[#allocation5 + $0x18] sm:$0xff]  ;;  %v65_v27 = vld [vmem:[#allocation5 + $0x30] sm:$0xff]  ;;  %v60_v28 = vld [vmem:[#allocation5 + $0x8] sm:$0xff] }
  0x18   :  { %101 = vmatpush.msra.mxu0 %v81_v11  ;;  %v63_v29 = vld [vmem:[#allocation5 + $0x20] sm:$0xff]  ;;  %v58_v30 = vld [vmem:[#allocation2] sm:$0xff]  ;;  %v61_v31 = vld [vmem:[#allocation5 + $0x10] sm:$0xff] }
  0x19   :  { %122 = vmatpush.msra.mxu1 %v80_v8  ;;  %v59_v32 = vld [vmem:[#allocation5] sm:$0xff] }
  0x1a   :  { %102 = vmatpush.msra.mxu0 %v79_v13  ;;  %v91_v33 = vld [vmem:[#allocation7] sm:$0x3] }
  0x1b   :  { %123 = vmatpush.msra.mxu1 %v78_v10  ;;  %v94_v34 = vperm.slane %v91_v33, 1  ;;  %v93_v40 = vperm.slane %v91_v33, 0 }
  0x1c   :  { %103 = vmatpush.msra.mxu0 %v77_v15 }
  0x1d   :  { %124 = vmatpush.msra.mxu1 %v76_v12 }
  0x1e   :  { %104 = vmatpush.msra.mxu0 %v75_v17 }
  0x1f   :  { %125 = vmatpush.msra.mxu1 %v74_v14 }
  0x20   :  { %105 = vmatpush.msra.mxu0 %v73_v19 }
  0x21   :  { %126 = vmatpush.msra.mxu1 %v72_v16 }
  0x22   :  { %106 = vmatpush.msra.mxu0 %v71_v21 }
  0x23   :  { %127 = vmatpush.msra.mxu1 %v70_v18 }
  0x24   :  { %107 = vmatpush.msra.mxu0 %v69_v23 }
  0x25   :  { %128 = vmatpush.msra.mxu1 %v68_v20 }
  0x26   :  { %108 = vmatpush.msra.mxu0 %v67_v25 }
  0x27   :  { %129 = vmatpush.msra.mxu1 %v66_v22 }
  0x28   :  { %109 = vmatpush.msra.mxu0 %v65_v27 }
  0x29   :  { %130 = vmatpush.msra.mxu1 %v64_v24 }
  0x2a   :  { %110 = vmatpush.msra.mxu0 %v63_v29 }
  0x2b   :  { %131 = vmatpush.msra.mxu1 %v62_v26 }
  0x2c   :  { %111 = vmatpush.msra.mxu0 %v61_v31 }
  0x2d   :  { %132 = vmatpush.msra.mxu1 %v60_v28 }
  0x2e   :  { %133 = vmatmul.f32.vlgmr.msra.gmra.mxu1 %v58_v30  ;;  %112 = vmatpush.msra.mxu0 %v59_v32 }
  0x2f   :  { %113 = vmatmul.f32.vlgmr.msra.gmra.mxu0 %v58_v30 }
  0xab   :  { %v134_v35 = vpop.f32.mrf.mxu1 }
  0xac   :  { %v135_v36 = vadd.f32 %v134_v35, %v94_v34  ;;  %v114_v41 = vpop.f32.mrf.mxu0 }
  0xad   :  { %v115_v42 = vadd.f32 %v114_v41, %v93_v40 }
  0xae   :  { %v179_v37 = vmul.f32 -1.442695, %v135_v36 }
  0xaf   :  { %v137_v46 = vmax.f32 %v115_v42, 0.0 }
  0xb0   :  { %186 = vpow2.f32 %v179_v37 }
  0xb1   :  { %v157_v51 = vsub.f32 %v137_v46, %v58_v30 }
  0xb6   :  { %v187_v38 = vpop.eup %186 }
  0xb7   :  { %v141_v39 = vadd.f32 1.0, %v187_v38 }
  0xb9   :  { %188 = vrcp.f32 %v141_v39  ;;  %v153_v47 = vand.u32 2147483648, %v141_v39  ;;  %v151_v49 = vand.u32 2147483647, %v141_v39  ;;  %vm147_vm1 = vweird.f32 %v141_v39 }
  0xbb   :  { %v154_v52 = vor.u32 1.1754944e-38, %v153_v47  ;;  %vm152_vm3 = vcmp.eq.f32.partialorder %v151_v49, 8.507059e+37 }
  0xbf   :  { %v189_v43 = vpop.eup %188 }
  0xc0   :  { %v143_v44 = vmul.f32 %v189_v43, %v141_v39  ;;  %vm148_vm0 = vweird.f32 %v189_v43 }
  0xc1   :  { %vm149_vm2 = vmor %vm147_vm1, %vm148_vm0 }
  0xc2   :  { %v144_v45 = vsub.f32 1.0, %v143_v44 }
  0xc4   :  { %v145_v48 = vmul.f32 %v189_v43, %v144_v45 }
  0xc6   :  { %v146_v50 = vadd.f32 %v189_v43, %v145_v48 }
  0xc8   :  { %v150_v53 = vsel %vm149_vm2, %v189_v43, %v146_v50 }
  0xc9   :  { %v155_v54 = vsel %vm152_vm3, %v154_v52, %v150_v53 }
  0xca   :  { %v158_v55 = vmul.f32 %v157_v51, %v155_v54 }
  0xcc   :  { %v159_v56 = vadd.f32 %v158_v55, %v58_v30 }
  0xce   :  { %160 = vst [vmem:[#allocation8] sm:$0xff] %v159_v56 }
  0xcf   :  { %171 = dma.vmem_to_hbm [thread:$0]  %s167_s2, 128, %s169_s30, [#allocation4]  }
  0xd0   :  { %290 = dma.done.wait [#allocation4], 128  }
  0xd1   :  { %291 = vsyncadd [#allocation4], 4294967168 }
  0xd2   :  { %176 = vsyncpa [#allocation3], 1 }
  0xd3   :  { %177 = vsyncpa [#allocation6], 1 }
  0xd4   :  { %178 = vsyncpa [#allocation4], 1 }

</bundles_post_ra>
